<compile_context>
chip_gen: v7x
topology: tpu7x:2x2x1
jax: 0.10.0
libtpu: 0.0.40
codegen_flags: <defaults>
</compile_context>

<pallas_src>
import functools

import jax
import jax.numpy as jnp
from jax.experimental import pallas as pl
from jax.experimental.pallas import tpu as pltpu

LANES = 128
SUBLANES = 8
MAX_TILE_ROWS = 1024  # 1024*128*4B = 512 KiB per streamed operand tile


def _cdiv(a, b):
    return -(-a // b)


# --------------- kernel A: rewards + log-ratio partial sums -----------------
def _kto_rewards_kernel(pc_ref, rc_ref, pr_ref, rr_ref,
                        cr_ref, rrw_ref, psum_c_ref, psum_r_ref,
                        *, beta, batch, tile_rows):
    t = pl.program_id(0)

    c_lr = pc_ref[...].astype(jnp.float32) - rc_ref[...].astype(jnp.float32)
    r_lr = pr_ref[...].astype(jnp.float32) - rr_ref[...].astype(jnp.float32)

    # Rewards: pure elementwise, written once (single HBM stream per array).
    cr_ref[...] = (beta * c_lr).astype(cr_ref.dtype)
    rrw_ref[...] = (beta * r_lr).astype(rrw_ref.dtype)

    # Validity mask for the padded tail / OOB rows of the edge tile.
    # jnp.where (select) so garbage/NaN from OOB reads never reaches the sums.
    row = jax.lax.broadcasted_iota(jnp.int32, c_lr.shape, 0) + t * tile_rows
    col = jax.lax.broadcasted_iota(jnp.int32, c_lr.shape, 1)
    valid = (row * LANES + col) < batch

    sum_c = jnp.sum(jnp.where(valid, c_lr, 0.0), axis=0, keepdims=True)  # (1,128)
    sum_r = jnp.sum(jnp.where(valid, r_lr, 0.0), axis=0, keepdims=True)  # (1,128)

    # Per-tile (8,128) partial-sum outputs (row 0 carries the sums, rows 1-7
    # are zero).  No resident scratch -> tile axis can be "parallel" (v7x).
    row8 = jax.lax.broadcasted_iota(jnp.int32, (SUBLANES, LANES), 0)
    psum_c_ref[...] = jnp.where(row8 == 0, sum_c, 0.0)
    psum_r_ref[...] = jnp.where(row8 == 0, sum_r, 0.0)


# --------------- kernel B: loss partial sums from the rewards ---------------
def _kto_loss_kernel(skl_ref, cr_ref, rrw_ref, lsum_ref, *, batch, tile_rows):
    t = pl.program_id(0)

    cr = cr_ref[...].astype(jnp.float32)    # = beta * chosen_logratios
    rrw = rrw_ref[...].astype(jnp.float32)  # = beta * rejected_logratios

    row = jax.lax.broadcasted_iota(jnp.int32, cr.shape, 0) + t * tile_rows
    col = jax.lax.broadcasted_iota(jnp.int32, cr.shape, 1)
    valid = (row * LANES + col) < batch

    # skl = [beta*rejected_KL, beta*chosen_KL] (f32 scalars in SMEM).
    # 1 - sigmoid(x) == sigmoid(-x):
    loss_c = jax.nn.sigmoid(skl_ref[0] - cr)    # 1 - sigmoid(beta*(c_lr - rejected_KL))
    loss_r = jax.nn.sigmoid(rrw - skl_ref[1])   # 1 - sigmoid(beta*(chosen_KL - r_lr))

    psum = jnp.sum(jnp.where(valid, loss_c + loss_r, 0.0), axis=0, keepdims=True)
    row8 = jax.lax.broadcasted_iota(jnp.int32, (SUBLANES, LANES), 0)
    lsum_ref[...] = jnp.where(row8 == 0, psum, 0.0)


# ----------------------------- wrappers --------------------------------------
def _kto_jnp(policy_chosen, policy_rejected, reference_chosen, reference_rejected, beta):
    c_lr = policy_chosen - reference_chosen
    r_lr = policy_rejected - reference_rejected
    chosen_kl = jnp.maximum(jnp.mean(c_lr), 0.0)
    rejected_kl = jnp.maximum(jnp.mean(r_lr), 0.0)
    losses = jnp.concatenate(
        [1.0 - jax.nn.sigmoid(beta * (c_lr - rejected_kl)),
         1.0 - jax.nn.sigmoid(beta * (chosen_kl - r_lr))], axis=0).mean()
    return losses, beta * c_lr, beta * r_lr


def vanilla_kto_loss(policy_chosen_logps, policy_rejected_logps,
                     reference_chosen_logps, reference_rejected_logps,
                     *, beta, max_tile_rows=MAX_TILE_ROWS, use_pallas=None):
    assert policy_chosen_logps.ndim == 1
    b = policy_chosen_logps.shape[0]
    for x in (policy_rejected_logps, reference_chosen_logps, reference_rejected_logps):
        assert x.shape == (b,), "even-sampling KTO expects equal-length inputs"

    if use_pallas is None:
        use_pallas = b >= LANES
    if not use_pallas:
        # Tiny batches: plain XLA fusion beats the pallas_call fixed cost.
        return _kto_jnp(policy_chosen_logps, policy_rejected_logps,
                        reference_chosen_logps, reference_rejected_logps, beta)

    dtype = policy_chosen_logps.dtype
    itemsize = jnp.dtype(dtype).itemsize
    rows = _cdiv(b, LANES)
    padded = rows * LANES
    if rows <= max_tile_rows:
        tile_rows = rows                                       # one full-array block
    else:
        tile_rows = max(SUBLANES, (max_tile_rows // SUBLANES) * SUBLANES)
    n_tiles = _cdiv(rows, tile_rows)

    def _prep(x):
        x = x.reshape(-1)
        if padded != b:                      # pad only the ragged lane tail
            x = jnp.pad(x, (0, padded - b))
        return x.reshape(rows, LANES)

    pc = _prep(policy_chosen_logps)
    rc = _prep(reference_chosen_logps)
    pr = _prep(policy_rejected_logps)
    rr = _prep(reference_rejected_logps)

    tile_spec = pl.BlockSpec((tile_rows, LANES), lambda t: (t, 0))
    psum_spec = pl.BlockSpec((SUBLANES, LANES), lambda t: (t, 0))

    # ---- pass 1: stream the 4 inputs once -> rewards + log-ratio partials ---
    cost_a = pl.CostEstimate(
        flops=8 * padded,
        transcendentals=0,
        bytes_accessed=int(6 * padded * itemsize + 2 * n_tiles * SUBLANES * LANES * 4))

    cr2d, rrw2d, psum_c, psum_r = pl.pallas_call(
        functools.partial(_kto_rewards_kernel, beta=float(beta), batch=int(b),
                          tile_rows=tile_rows),
        out_shape=(
            jax.ShapeDtypeStruct((rows, LANES), dtype),                      # chosen rewards
            jax.ShapeDtypeStruct((rows, LANES), dtype),                      # rejected rewards
            jax.ShapeDtypeStruct((n_tiles * SUBLANES, LANES), jnp.float32),  # sum(c_lr) partials
            jax.ShapeDtypeStruct((n_tiles * SUBLANES, LANES), jnp.float32),  # sum(r_lr) partials
        ),
        grid_spec=pltpu.PrefetchScalarGridSpec(
            num_scalar_prefetch=0,
            grid=(n_tiles,),
            in_specs=[tile_spec, tile_spec, tile_spec, tile_spec],
            out_specs=[tile_spec, tile_spec, psum_spec, psum_spec],
        ),
        compiler_params=pltpu.CompilerParams(dimension_semantics=("parallel",)),
        cost_estimate=cost_a,
    )(pc, rc, pr, rr)

    # ---- tiny XLA reduction of the partials -> KL scalars --------------------
    inv_b = 1.0 / float(b)
    chosen_kl = jnp.maximum(jnp.sum(psum_c) * inv_b, 0.0)
    rejected_kl = jnp.maximum(jnp.sum(psum_r) * inv_b, 0.0)
    skl = jnp.stack([beta * rejected_kl, beta * chosen_kl]).astype(jnp.float32)

    # ---- pass 2: stream only the 2 reward arrays -> loss partial sums --------
    cost_b = pl.CostEstimate(
        flops=10 * padded,
        transcendentals=2 * padded,
        bytes_accessed=int(2 * padded * itemsize + n_tiles * SUBLANES * LANES * 4 + 8))

    lsum = pl.pallas_call(
        functools.partial(_kto_loss_kernel, batch=int(b), tile_rows=tile_rows),
        out_shape=jax.ShapeDtypeStruct((n_tiles * SUBLANES, LANES), jnp.float32),
        grid_spec=pltpu.PrefetchScalarGridSpec(
            num_scalar_prefetch=0,
            grid=(n_tiles,),
            in_specs=[pl.BlockSpec(memory_space=pltpu.MemorySpace.SMEM),  # scaled KLs
                      tile_spec, tile_spec],
            out_specs=psum_spec,
        ),
        compiler_params=pltpu.CompilerParams(dimension_semantics=("parallel",)),
        cost_estimate=cost_b,
    )(skl, cr2d, rrw2d)

    loss = jnp.sum(lsum) * (1.0 / float(2 * b))

    # NOTE: for bf16 inputs the rewards are stored at input precision (matching
    # the module's output dtype); kernel B recovers them in f32 for the loss.
    cr_flat = cr2d.reshape(-1)
    rrw_flat = rrw2d.reshape(-1)
    if padded != b:
        cr_flat = cr_flat[:b]
        rrw_flat = rrw_flat[:b]
    return loss, cr_flat, rrw_flat


if __name__ == "__main__":
    beta = 0.1

    def _make_inputs(key, batch):
        k1, k2, k3, k4 = jax.random.split(key, 4)
        # log-probs are negative numbers
        pol_c = -jax.random.uniform(k1, (batch,), jnp.float32, 0.1, 5.0)
        pol_r = -jax.random.uniform(k2, (batch,), jnp.float32, 0.1, 5.0)
        ref_c = -jax.random.uniform(k3, (batch,), jnp.float32, 0.1, 5.0)
        ref_r = -jax.random.uniform(k4, (batch,), jnp.float32, 0.1, 5.0)
        return pol_c, pol_r, ref_c, ref_r

    key = jax.random.PRNGKey(0)
    cases = [
        dict(batch=1024, max_tile_rows=MAX_TILE_ROWS),  # lane-aligned, no pad, 1 tile
        dict(batch=3000, max_tile_rows=8),              # multi-tile + padded lane tail
        dict(batch=1300, max_tile_rows=8),              # multi-tile + ragged edge block
    ]
    for i, case in enumerate(cases):
        key, sub = jax.random.split(key)
        pol_c, pol_r, ref_c, ref_r = _make_inputs(sub, case["batch"])

        loss, cr, rrw = vanilla_kto_loss(
            pol_c, pol_r, ref_c, ref_r,
            beta=beta, max_tile_rows=case["max_tile_rows"])
        loss = jax.block_until_ready(loss)
        cr = jax.block_until_ready(cr)
        rrw = jax.block_until_ready(rrw)

        exp_loss, exp_cr, exp_rrw = _kto_jnp(pol_c, pol_r, ref_c, ref_r, beta)
        assert jnp.allclose(loss, exp_loss, rtol=1e-4, atol=1e-5), (i, loss, exp_loss)
        assert jnp.allclose(cr, exp_cr, rtol=1e-5, atol=1e-5), i
        assert jnp.allclose(rrw, exp_rrw, rtol=1e-5, atol=1e-5), i

    print("KERNEL_OK")
</pallas_src>

<mosaic_0001>
module attributes {stable_mosaic.version = 11 : i64} {
  func.func @_kto_rewards_kernel(%arg0: i32, %arg1: memref<8x128xf32, #tpu.memory_space<vmem>>, %arg2: memref<8x128xf32, #tpu.memory_space<vmem>>, %arg3: memref<8x128xf32, #tpu.memory_space<vmem>>, %arg4: memref<8x128xf32, #tpu.memory_space<vmem>>, %arg5: memref<8x128xf32, #tpu.memory_space<vmem>>, %arg6: memref<8x128xf32, #tpu.memory_space<vmem>>, %arg7: memref<8x128xf32, #tpu.memory_space<vmem>>, %arg8: memref<8x128xf32, #tpu.memory_space<vmem>>) attributes {dimension_semantics = [#tpu.dimension_semantics<parallel>], iteration_bounds = array<i64: 1>, scalar_prefetch = 0 : i64, scratch_operands = 0 : i64, tpu.core_type = #tpu.core_type<tc>, window_params = [{transform_indices = @transform_0, window_bounds = array<i64: 8, 128>}, {transform_indices = @transform_1, window_bounds = array<i64: 8, 128>}, {transform_indices = @transform_2, window_bounds = array<i64: 8, 128>}, {transform_indices = @transform_3, window_bounds = array<i64: 8, 128>}, {transform_indices = @transform_4, window_bounds = array<i64: 8, 128>}, {transform_indices = @transform_5, window_bounds = array<i64: 8, 128>}, {transform_indices = @transform_6, window_bounds = array<i64: 8, 128>}, {transform_indices = @transform_7, window_bounds = array<i64: 8, 128>}]} {
    %c0 = arith.constant 0 : index
    %c0_0 = arith.constant 0 : index
    %0 = vector.load %arg1[%c0, %c0_0] : memref<8x128xf32, #tpu.memory_space<vmem>>, vector<8x128xf32>
    %c0_1 = arith.constant 0 : index
    %c0_2 = arith.constant 0 : index
    %1 = vector.load %arg2[%c0_1, %c0_2] : memref<8x128xf32, #tpu.memory_space<vmem>>, vector<8x128xf32>
    %2 = arith.subf %0, %1 : vector<8x128xf32>
    %c0_3 = arith.constant 0 : index
    %c0_4 = arith.constant 0 : index
    %3 = vector.load %arg3[%c0_3, %c0_4] : memref<8x128xf32, #tpu.memory_space<vmem>>, vector<8x128xf32>
    %c0_5 = arith.constant 0 : index
    %c0_6 = arith.constant 0 : index
    %4 = vector.load %arg4[%c0_5, %c0_6] : memref<8x128xf32, #tpu.memory_space<vmem>>, vector<8x128xf32>
    %5 = arith.subf %3, %4 : vector<8x128xf32>
    %cst = arith.constant 1.000000e-01 : f32
    %6 = vector.broadcast %cst : f32 to vector<8x128xf32>
    %7 = arith.mulf %6, %2 : vector<8x128xf32>
    %c0_7 = arith.constant 0 : index
    %c0_8 = arith.constant 0 : index
    %8 = vector.load %arg5[%c0_7, %c0_8] : memref<8x128xf32, #tpu.memory_space<vmem>>, vector<8x128xf32>
    tpu.vector_store %arg5[%c0_7, %c0_8], %7 {strides = array<i32>} : memref<8x128xf32, #tpu.memory_space<vmem>>, vector<8x128xf32>,
    %cst_9 = arith.constant 1.000000e-01 : f32
    %9 = vector.broadcast %cst_9 : f32 to vector<8x128xf32>
    %10 = arith.mulf %9, %5 : vector<8x128xf32>
    %c0_10 = arith.constant 0 : index
    %c0_11 = arith.constant 0 : index
    %11 = vector.load %arg6[%c0_10, %c0_11] : memref<8x128xf32, #tpu.memory_space<vmem>>, vector<8x128xf32>
    tpu.vector_store %arg6[%c0_10, %c0_11], %10 {strides = array<i32>} : memref<8x128xf32, #tpu.memory_space<vmem>>, vector<8x128xf32>,
    %12 = tpu.iota {dimensions = array<i32: 0>} : vector<8x128xi32>
    %c8_i32 = arith.constant 8 : i32
    %13 = arith.muli %arg0, %c8_i32 : i32
    %14 = vector.broadcast %13 : i32 to vector<8x128xi32>
    %15 = arith.addi %12, %14 : vector<8x128xi32>
    %16 = tpu.iota {dimensions = array<i32: 1>} : vector<8x128xi32>
    %c128_i32 = arith.constant 128 : i32
    %17 = vector.broadcast %c128_i32 : i32 to vector<8x128xi32>
    %18 = arith.muli %15, %17 : vector<8x128xi32>
    %19 = arith.addi %18, %16 : vector<8x128xi32>
    %c1024_i32 = arith.constant 1024 : i32
    %20 = vector.broadcast %c1024_i32 : i32 to vector<8x128xi32>
    %21 = arith.cmpi slt, %19, %20 : vector<8x128xi32>
    %cst_12 = arith.constant 0.000000e+00 : f32
    %22 = vector.broadcast %cst_12 : f32 to vector<8x128xf32>
    %23 = arith.select %21, %2, %22 : vector<8x128xi1>, vector<8x128xf32>
    %cst_13 = arith.constant dense<0.000000e+00> : vector<128xf32>
    %24 = vector.multi_reduction <add>, %23, %cst_13 [0] : vector<8x128xf32> to vector<128xf32>
    %25 = vector.shape_cast %24 : vector<128xf32> to vector<1x128xf32>
    %cst_14 = arith.constant 0.000000e+00 : f32
    %26 = vector.broadcast %cst_14 : f32 to vector<8x128xf32>
    %27 = arith.select %21, %5, %26 : vector<8x128xi1>, vector<8x128xf32>
    %cst_15 = arith.constant dense<0.000000e+00> : vector<128xf32>
    %28 = vector.multi_reduction <add>, %27, %cst_15 [0] : vector<8x128xf32> to vector<128xf32>
    %29 = vector.shape_cast %28 : vector<128xf32> to vector<1x128xf32>
    %30 = tpu.iota {dimensions = array<i32: 0>} : vector<8x128xi32>
    %c0_i32 = arith.constant 0 : i32
    %31 = vector.broadcast %c0_i32 : i32 to vector<8x128xi32>
    %32 = arith.cmpi eq, %30, %31 : vector<8x128xi32>
    %cst_16 = arith.constant 0.000000e+00 : f32
    %33 = vector.shape_cast %25 : vector<1x128xf32> to vector<1x128xf32>
    %34 = vector.broadcast %33 : vector<1x128xf32> to vector<8x128xf32>
    %35 = vector.broadcast %cst_16 : f32 to vector<8x128xf32>
    %36 = arith.select %32, %34, %35 : vector<8x128xi1>, vector<8x128xf32>
    %c0_17 = arith.constant 0 : index
    %c0_18 = arith.constant 0 : index
    %37 = vector.load %arg7[%c0_17, %c0_18] : memref<8x128xf32, #tpu.memory_space<vmem>>, vector<8x128xf32>
    tpu.vector_store %arg7[%c0_17, %c0_18], %36 {strides = array<i32>} : memref<8x128xf32, #tpu.memory_space<vmem>>, vector<8x128xf32>,
    %c0_i32_19 = arith.constant 0 : i32
    %38 = vector.broadcast %c0_i32_19 : i32 to vector<8x128xi32>
    %39 = arith.cmpi eq, %30, %38 : vector<8x128xi32>
    %cst_20 = arith.constant 0.000000e+00 : f32
    %40 = vector.shape_cast %29 : vector<1x128xf32> to vector<1x128xf32>
    %41 = vector.broadcast %40 : vector<1x128xf32> to vector<8x128xf32>
    %42 = vector.broadcast %cst_20 : f32 to vector<8x128xf32>
    %43 = arith.select %39, %41, %42 : vector<8x128xi1>, vector<8x128xf32>
    %c0_21 = arith.constant 0 : index
    %c0_22 = arith.constant 0 : index
    %44 = vector.load %arg8[%c0_21, %c0_22] : memref<8x128xf32, #tpu.memory_space<vmem>>, vector<8x128xf32>
    tpu.vector_store %arg8[%c0_21, %c0_22], %43 {strides = array<i32>} : memref<8x128xf32, #tpu.memory_space<vmem>>, vector<8x128xf32>,
    return
  }
  func.func @transform_0(%arg0: i32) -> (i32, i32) {
    %c0_i32 = arith.constant 0 : i32
    %c0_i32_0 = arith.constant 0 : i32
    return %arg0, %c0_i32 : i32, i32
  }
  func.func @transform_1(%arg0: i32) -> (i32, i32) {
    %c0_i32 = arith.constant 0 : i32
    %c0_i32_0 = arith.constant 0 : i32
    return %arg0, %c0_i32 : i32, i32
  }
  func.func @transform_2(%arg0: i32) -> (i32, i32) {
    %c0_i32 = arith.constant 0 : i32
    %c0_i32_0 = arith.constant 0 : i32
    return %arg0, %c0_i32 : i32, i32
  }
  func.func @transform_3(%arg0: i32) -> (i32, i32) {
    %c0_i32 = arith.constant 0 : i32
    %c0_i32_0 = arith.constant 0 : i32
    return %arg0, %c0_i32 : i32, i32
  }
  func.func @transform_4(%arg0: i32) -> (i32, i32) {
    %c0_i32 = arith.constant 0 : i32
    %c0_i32_0 = arith.constant 0 : i32
    return %arg0, %c0_i32 : i32, i32
  }
  func.func @transform_5(%arg0: i32) -> (i32, i32) {
    %c0_i32 = arith.constant 0 : i32
    %c0_i32_0 = arith.constant 0 : i32
    return %arg0, %c0_i32 : i32, i32
  }
  func.func @transform_6(%arg0: i32) -> (i32, i32) {
    %c0_i32 = arith.constant 0 : i32
    %c0_i32_0 = arith.constant 0 : i32
    return %arg0, %c0_i32 : i32, i32
  }
  func.func @transform_7(%arg0: i32) -> (i32, i32) {
    %c0_i32 = arith.constant 0 : i32
    %c0_i32_0 = arith.constant 0 : i32
    return %arg0, %c0_i32 : i32, i32
  }
}

</mosaic_0001>

<bundles_post_ra>
// kernel: tpu_custom_call.1
= control target key start
LH: loop header
LB: loop body
LE: loop exit
PB: predicated region body
PF: predicated region fallthrough
CT: control target
= control target key end

     0   :  { %13 = vsyncpa [#allocation3], 0  ;;  %s478_s0 = inlined_call_operand.hbm [shape: f32[8,128], index: 0, kind: input, shape index: {}]   ;;  %s479_s1 = inlined_call_operand.hbm [shape: f32[8,128], index: 1, kind: input, shape index: {}]   ;;  %s480_s2 = inlined_call_operand.hbm [shape: f32[8,128], index: 2, kind: input, shape index: {}]   ;;  %s481_s3 = inlined_call_operand.vmem [shape: f32[8,128], index: 3, kind: input, shape index: {}]   ;;  %s482_s4 = inlined_call_operand.hbm [shape: f32[8,128], index: 4, kind: output, shape index: {0}]   ;;  %s483_s5 = inlined_call_operand.hbm [shape: f32[8,128], index: 5, kind: output, shape index: {1}]   ;;  %s484_s6 = inlined_call_operand.hbm [shape: f32[8,128], index: 6, kind: output, shape index: {2}]   ;;  %s485_s7 = inlined_call_operand.hbm [shape: f32[8,128], index: 7, kind: output, shape index: {3}]  }
   0x1   :  { %14 = vsyncpa [#allocation6], 0 }
   0x2   :  { %15 = vsyncpa [#allocation4], 0 }
   0x3   :  { %16 = vsyncpa [#allocation10], 0 }
   0x4   :  { %17 = vsyncpa [#allocation13], 0  ;;  %s326_s24 = smov [#allocation5]   ;;  %s327_s26 = smov [#allocation2]  }
   0x5   :  { %s34_s25 = sshll.u32 %s326_s24, 4  ;;  %s24_s27 = sshll.u32 %s327_s26, 4  ;;  %s35_s25 = int_to_ptr.vmem [resolvable:$true] %s34_s25  ;;  %s25_s27 = int_to_ptr.vmem [resolvable:$true] %s24_s27 }
   0x6   :  { %s162_s30 = scalar_lea.hbm %s479_s1, 128 }
   0x7   :  { %p163_p0 = scmp.ne.s32.totalorder %s479_s1, %s162_s30  ;;  %p166_p1 = scmp.lt.u32.totalorder %s162_s30, %s479_s1 }
   0x9   :  { %p168_p2 = pnand %p166_p1, %p163_p0 }
   0xb   :  { %171 = shalt.err (!%p168_p2)
}
   0xc   :  { %s172_s12 = scalar_lea.vmem %s35_s25, 128  ;;  %p177_p4 = scmp.lt.s32.totalorder %s35_s25, %s35_s25 }
   0xd   :  { %p173_p3 = scmp.ne.s32.totalorder %s35_s25, %s172_s12  ;;  %p178_p5 = scmp.lt.s32.totalorder %s172_s12, %s172_s12 }
   0xf   :  { %p179_p6 = por %p178_p5, %p177_p4 }
  0x11   :  { %p180_p7 = pnand %p179_p6, %p173_p3 }
  0x13   :  { %183 = shalt.err (!%p180_p7)
}
  0x14   :  { %37 = dma.hbm_to_vmem [thread:$0]  %s479_s1, 128, %s35_s25, [#allocation6]  }
  0x15   :  { %s184_s17 = scalar_lea.hbm %s478_s0, 128 }
  0x16   :  { %p185_p8 = scmp.ne.s32.totalorder %s478_s0, %s184_s17  ;;  %p188_p9 = scmp.lt.u32.totalorder %s184_s17, %s478_s0 }
  0x18   :  { %p190_p10 = pnand %p188_p9, %p185_p8 }
  0x1a   :  { %193 = shalt.err (!%p190_p10)
}
  0x1b   :  { %s194_s22 = scalar_lea.vmem %s25_s27, 128  ;;  %p199_p12 = scmp.lt.s32.totalorder %s25_s27, %s25_s27 }
  0x1c   :  { %p195_p11 = scmp.ne.s32.totalorder %s25_s27, %s194_s22  ;;  %p200_p13 = scmp.lt.s32.totalorder %s194_s22, %s194_s22 }
  0x1e   :  { %p201_p0 = por %p200_p13, %p199_p12 }
  0x20   :  { %p202_p1 = pnand %p201_p0, %p195_p11 }
  0x22   :  { %205 = shalt.err (!%p202_p1)
}
  0x23   :  { %27 = dma.hbm_to_vmem [thread:$0]  %s478_s0, 128, %s25_s27, [#allocation3]  }
  0x24   :  { %s328_s24 = smov [#allocation7]   ;;  %s206_s29 = scalar_lea.hbm %s480_s2, 128 }
  0x25   :  { %s44_s25 = sshll.u32 %s328_s24, 4  ;;  %p207_p2 = scmp.ne.s32.totalorder %s480_s2, %s206_s29  ;;  %s45_s25 = int_to_ptr.vmem [resolvable:$true] %s44_s25 }
  0x26   :  { %p210_p3 = scmp.lt.u32.totalorder %s206_s29, %s480_s2 }
  0x28   :  { %p212_p4 = pnand %p210_p3, %p207_p2 }
  0x2a   :  { %215 = shalt.err (!%p212_p4)
}
  0x2b   :  { %s216_s11 = scalar_lea.vmem %s45_s25, 128  ;;  %p221_p6 = scmp.lt.s32.totalorder %s45_s25, %s45_s25 }
  0x2c   :  { %p217_p5 = scmp.ne.s32.totalorder %s45_s25, %s216_s11  ;;  %p222_p7 = scmp.lt.s32.totalorder %s216_s11, %s216_s11 }
  0x2e   :  { %p223_p8 = por %p222_p7, %p221_p6 }
  0x30   :  { %p224_p9 = pnand %p223_p8, %p217_p5 }
  0x32   :  { %227 = shalt.err (!%p224_p9)
}
  0x33   :  { %47 = dma.hbm_to_vmem [thread:$0]  %s480_s2, 128, %s45_s25, [#allocation6]  }
  0x34   :  { %316 = dma.done.wait [#allocation3], 128  }
  0x35   :  { %317 = vsyncadd [#allocation3], 4294967168 }
  0x36   :  { %318 = dma.done.wait [#allocation6], 256  }
  0x37   :  { %319 = vsyncadd [#allocation6], 4294967040  ;;  %v69_v0 = vlaneseq  ;;  %v62_v5 = vld [vmem:[#allocation7] sm:$0xff]  ;;  %v63_v6 = vld [vmem:[%s481_s3] sm:$0xff]  ;;  %s329_s14 = smov [#allocation9]   ;;  %s330_s2 = smov [#allocation8]  }
  0x38   :  { %v59_v7 = vld [vmem:[#allocation2] sm:$0xff]  ;;  %s114_s15 = sshll.u32 %s329_s14, 4  ;;  %v64_v8 = vsub.f32 %v62_v5, %v63_v6  ;;  %v60_v9 = vld [vmem:[#allocation5] sm:$0xff]  ;;  %s104_s16 = sshll.u32 %s330_s2, 4  ;;  %s115_s15 = int_to_ptr.vmem [resolvable:$true] %s114_s15  ;;  %s415_s16 = int_to_ptr.vmem [resolvable:$true] %s104_s16 }
  0x39   :  { %v409_v1 = vshrl.u32 %v69_v0, 7  ;;  %v75_v2 = vand.u32 127, %v69_v0  ;;  %v61_v10 = vsub.f32 %v59_v7, %v60_v9  ;;  %s228_s3 = scalar_lea.vmem %s115_s15, 128  ;;  %p233_p11 = scmp.lt.s32.totalorder %s115_s15, %s115_s15 }
  0x3a   :  { %v67_v11 = vmul.f32 0.1, %v64_v8  ;;  %p229_p10 = scmp.ne.s32.totalorder %s115_s15, %s228_s3  ;;  %p234_p12 = scmp.lt.s32.totalorder %s228_s3, %s228_s3 }
  0x3b   :  { %v76_v3 = vmul.u32 128, %v409_v1  ;;  %v65_v13 = vmul.f32 0.1, %v61_v10 }
  0x3c   :  { %68 = vst [vmem:[#allocation9] sm:$0xff] %v67_v11  ;;  %p235_p13 = por %p234_p12, %p233_p11 }
  0x3d   :  { %v77_v4 = vadd.s32 %v76_v3, %v75_v2  ;;  %66 = vst [vmem:[#allocation8] sm:$0xff] %v65_v13 }
  0x3e   :  { %p236_p0 = pnand %p235_p13, %p229_p10 }
  0x3f   :  { %vm78_vm0 = vcmp.lt.s32.totalorder %v77_v4, 1024 }
  0x40   :  { %v86_v12 = vsel %vm78_vm0, %v64_v8, 0.0  ;;  %v79_v14 = vsel %vm78_vm0, %v61_v10, 0.0 }
  0x41   :  { %v87_v15 = vrot.slane %v86_v12, 4  ;;  %v80_v16 = vrot.slane %v79_v14, 4 }
  0x43   :  { %v88_v17 = vadd.f32 %v87_v15, %v86_v12 }
  0x44   :  { %239 = shalt.err (!%p236_p0)
}
  0x45   :  { %s240_s19 = scalar_lea.hbm %s483_s5, 128 }
  0x46   :  { %p241_p1 = scmp.ne.s32.totalorder %s483_s5, %s240_s19  ;;  %p244_p2 = scmp.lt.u32.totalorder %s240_s19, %s483_s5 }
  0x48   :  { %p246_p3 = pnand %p244_p2, %p241_p1 }
  0x4a   :  { %249 = shalt.err (!%p246_p3)
}
  0x4b   :  { %117 = dma.vmem_to_hbm [thread:$0]  %s115_s15, 128, %s483_s5, [#allocation10]   ;;  %v81_v18 = vadd.f32 %v80_v16, %v79_v14 }
  0x4c   :  { %s250_s25 = scalar_lea.vmem %s415_s16, 128  ;;  %p255_p5 = scmp.lt.s32.totalorder %s415_s16, %s415_s16 }
  0x4d   :  { %p251_p4 = scmp.ne.s32.totalorder %s415_s16, %s250_s25  ;;  %p256_p6 = scmp.lt.s32.totalorder %s250_s25, %s250_s25 }
  0x4f   :  { %p257_p7 = por %p256_p6, %p255_p5 }
  0x51   :  { %p258_p8 = pnand %p257_p7, %p251_p4 }
  0x53   :  { %261 = shalt.err (!%p258_p8)
}
  0x54   :  { %s262_s29 = scalar_lea.hbm %s482_s4, 128 }
  0x55   :  { %p263_p9 = scmp.ne.s32.totalorder %s482_s4, %s262_s29  ;;  %p266_p10 = scmp.lt.u32.totalorder %s262_s29, %s482_s4 }
  0x57   :  { %p268_p11 = pnand %p266_p10, %p263_p9 }
  0x59   :  { %271 = shalt.err (!%p268_p11)
}
  0x5a   :  { %107 = dma.vmem_to_hbm [thread:$0]  %s415_s16, 128, %s482_s4, [#allocation4]   ;;  %v89_v19 = vrot.slane %v88_v17, 2  ;;  %v82_v20 = vrot.slane %v81_v18, 2  ;;  %vm93_vm1 = vcmp.eq.s32.totalorder %v409_v1, 0 }
  0x5b   :  { %s331_s0 = smov [#allocation12]   ;;  %s332_s12 = smov [#allocation11]  }
  0x5c   :  { %v90_v21 = vadd.f32 %v89_v19, %v88_v17  ;;  %v83_v22 = vadd.f32 %v82_v20, %v81_v18  ;;  %s134_s27 = sshll.u32 %s331_s0, 4  ;;  %s124_s13 = sshll.u32 %s332_s12, 4  ;;  %s135_s27 = int_to_ptr.vmem [resolvable:$true] %s134_s27  ;;  %s447_s13 = int_to_ptr.vmem [resolvable:$true] %s124_s13 }
  0x5d   :  { %s272_s4 = scalar_lea.vmem %s135_s27, 128  ;;  %p277_p13 = scmp.lt.s32.totalorder %s135_s27, %s135_s27 }
  0x5e   :  { %v91_v23 = vrot.slane %v90_v21, 1  ;;  %v84_v24 = vrot.slane %v83_v22, 1  ;;  %p273_p12 = scmp.ne.s32.totalorder %s135_s27, %s272_s4  ;;  %p278_p0 = scmp.lt.s32.totalorder %s272_s4, %s272_s4 }
  0x60   :  { %v92_v25 = vadd.f32 %v91_v23, %v90_v21  ;;  %v85_v26 = vadd.f32 %v84_v24, %v83_v22  ;;  %p279_p1 = por %p278_p0, %p277_p13 }
  0x62   :  { %v96_v27 = vsel %vm93_vm1, %v92_v25, 0.0  ;;  %v94_v28 = vsel %vm93_vm1, %v85_v26, 0.0  ;;  %p280_p2 = pnand %p279_p1, %p273_p12 }
  0x63   :  { %97 = vst [vmem:[#allocation12] sm:$0xff] %v96_v27  ;;  %95 = vst [vmem:[#allocation11] sm:$0xff] %v94_v28 }
  0x64   :  { %283 = shalt.err (!%p280_p2)
}
  0x65   :  { %s284_s2 = scalar_lea.hbm %s485_s7, 128 }
  0x66   :  { %p285_p3 = scmp.ne.s32.totalorder %s485_s7, %s284_s2  ;;  %p288_p4 = scmp.lt.u32.totalorder %s284_s2, %s485_s7 }
  0x68   :  { %p290_p5 = pnand %p288_p4, %p285_p3 }
  0x6a   :  { %293 = shalt.err (!%p290_p5)
}
  0x6b   :  { %137 = dma.vmem_to_hbm [thread:$0]  %s135_s27, 128, %s485_s7, [#allocation13]  }
  0x6c   :  { %s294_s21 = scalar_lea.vmem %s447_s13, 128  ;;  %p299_p7 = scmp.lt.s32.totalorder %s447_s13, %s447_s13 }
  0x6d   :  { %p295_p6 = scmp.ne.s32.totalorder %s447_s13, %s294_s21  ;;  %p300_p8 = scmp.lt.s32.totalorder %s294_s21, %s294_s21 }
  0x6f   :  { %p301_p9 = por %p300_p8, %p299_p7 }
  0x71   :  { %p302_p10 = pnand %p301_p9, %p295_p6 }
  0x73   :  { %305 = shalt.err (!%p302_p10)
}
  0x74   :  { %s306_s23 = scalar_lea.hbm %s484_s6, 128 }
  0x75   :  { %p307_p11 = scmp.ne.s32.totalorder %s484_s6, %s306_s23  ;;  %p310_p12 = scmp.lt.u32.totalorder %s306_s23, %s484_s6 }
  0x77   :  { %p312_p13 = pnand %p310_p12, %p307_p11 }
  0x79   :  { %315 = shalt.err (!%p312_p13)
}
  0x7a   :  { %127 = dma.vmem_to_hbm [thread:$0]  %s447_s13, 128, %s484_s6, [#allocation10]  }
  0x7b   :  { %320 = dma.done.wait [#allocation4], 128  }
  0x7c   :  { %321 = vsyncadd [#allocation4], 4294967168 }
  0x7d   :  { %322 = dma.done.wait [#allocation10], 256  }
  0x7e   :  { %323 = vsyncadd [#allocation10], 4294967040 }
  0x7f   :  { %324 = dma.done.wait [#allocation13], 128  }
  0x80   :  { %325 = vsyncadd [#allocation13], 4294967168 }
  0x81   :  { %150 = vsyncpa [#allocation3], 1 }
  0x82   :  { %151 = vsyncpa [#allocation6], 1 }
  0x83   :  { %152 = vsyncpa [#allocation4], 1 }
  0x84   :  { %153 = vsyncpa [#allocation10], 1 }
  0x85   :  { %154 = vsyncpa [#allocation13], 1 }

</bundles_post_ra>
